<compile_context>
chip_gen: v6e
topology: v6e:2x2x1
jax: 0.10.0
libtpu: 0.0.40
codegen_flags: <defaults>
</compile_context>

<pallas_src>
import functools

import jax
import jax.numpy as jnp
from jax import lax
from jax.experimental import pallas as pl
from jax.experimental.pallas import tpu as pltpu

LANES = 128
DEFAULT_BLOCK_ROWS = 4096            # (4096,128) f32 = 2 MiB per input block
VMEM_LIMIT_BYTES = 32 * 1024 * 1024  # explicit so the block size is never capped
ACC_ROWS_PREFERRED = 32              # 32 independent accumulator vregs (ILP)


def _num_tensorcores():
    """TensorCores addressable by one pallas_call on this device.

    v4 / v5p (megacore) and v7x expose 2 TensorCores per device; v2/v3/v5e/v6e
    expose 1.  Detection errors are benign: too-low only loses the 2-way split,
    too-high only adds one masked (zero-contribution) tile per extra core.
    """
    try:
        kind = jax.devices()[0].device_kind.lower()
    except Exception:
        return 1
    if any(tag in kind for tag in ("v4", "v5p", "v7", "7x")):
        return 2
    return 1


def _wmse_kernel(pred_ref, target_ref, out_ref, *,
                 pos_weight, neg_weight, rows, block_rows, tiles_per_core,
                 needs_mask):
    c = pl.program_id(0)   # core / partial-sum index ("parallel")
    j = pl.program_id(1)   # row-tile index within this core ("arbitrary")

    @pl.when(j == 0)
    def _():
        out_ref[...] = jnp.zeros_like(out_ref)

    p = pred_ref[...].astype(jnp.float32)
    t = target_ref[...].astype(jnp.float32)
    diff = p - t
    w = jnp.where(t > 0, jnp.float32(pos_weight), jnp.float32(neg_weight))
    contrib = diff * diff * w

    acc_rows = out_ref.shape[1]

    def fold(x):
        # Fold (block_rows,128) onto the (acc_rows,128) accumulator with pure
        # VPU adds; acc_rows independent chains keep ILP across the VALUs.
        if block_rows != acc_rows:
            x = x.reshape(-1, acc_rows, LANES).sum(axis=0)
        return x.reshape(out_ref.shape)

    if not needs_mask:
        out_ref[...] += fold(contrib)
    else:
        # Row masking only on boundary / past-the-end tiles; interior tiles
        # take the mask-free fast path.
        row0 = (c * tiles_per_core + j) * block_rows
        in_bounds = row0 + block_rows <= rows

        @pl.when(in_bounds)
        def _():
            out_ref[...] += fold(contrib)

        @pl.when(jnp.logical_not(in_bounds))
        def _():
            local_row = lax.broadcasted_iota(jnp.int32, contrib.shape, 0)
            limit = rows - row0          # <= 0 for fully out-of-range tiles
            masked = jnp.where(local_row < limit, contrib, jnp.float32(0.0))
            out_ref[...] += fold(masked)


def weighted_mse_loss(pred, target, pos_weight=4, neg_weight=1):
    assert pred.shape == target.shape
    n = pred.size
    assert n > 0

    # Flatten to a lane-dense (rows, 128) slab in the *native* dtype (the cast
    # to f32 happens on-chip).  For lane-aligned element counts this is a free
    # reshape; only a ragged lane tail triggers a pad pass.
    # TODO(synk): stream the raw 1-D arrays and mask the <128-element lane tail
    # in-kernel to remove the pad pass for non-128-aligned inputs as well.
    pred_f = pred.reshape(-1)
    target_f = target.reshape(-1)
    rows = (n + LANES - 1) // LANES
    padded = rows * LANES
    if padded != n:
        pred_f = jnp.pad(pred_f, (0, padded - n))
        target_f = jnp.pad(target_f, (0, padded - n))
    pred2d = pred_f.reshape(rows, LANES)
    target2d = target_f.reshape(rows, LANES)

    # Dtype-aware sublane rounding of the streamed blocks: 8 rows/vreg group
    # for 4-byte dtypes, 16 for 2-byte, 32 for 1-byte.
    itemsize = min(jnp.dtype(pred2d.dtype).itemsize,
                   jnp.dtype(target2d.dtype).itemsize)
    packing = 8 * max(1, 4 // max(1, itemsize))
    if rows >= packing:
        block_rows = min(DEFAULT_BLOCK_ROWS, (rows // packing) * packing)
    else:
        block_rows = rows        # block dim == full array dim: always legal

    total_tiles = (rows + block_rows - 1) // block_rows
    num_cores = min(_num_tensorcores(), total_tiles)
    tiles_per_core = (total_tiles + num_cores - 1) // num_cores
    needs_mask = (num_cores * tiles_per_core * block_rows) != rows

    # Accumulator width (f32 sublanes) living directly in the output block.
    if block_rows % ACC_ROWS_PREFERRED == 0 and block_rows > ACC_ROWS_PREFERRED:
        acc_rows = ACC_ROWS_PREFERRED
    elif block_rows % 8 == 0 and block_rows > 8:
        acc_rows = 8
    else:
        acc_rows = block_rows

    def in_map(c, j):
        # Clamp so any past-the-end tile (uneven core split) still maps to
        # valid data; the in-kernel mask zeroes its contribution.
        return (jnp.minimum(c * tiles_per_core + j, total_tiles - 1), 0)

    kernel = functools.partial(
        _wmse_kernel,
        pos_weight=float(pos_weight),
        neg_weight=float(neg_weight),
        rows=rows,
        block_rows=block_rows,
        tiles_per_core=tiles_per_core,
        needs_mask=needs_mask,
    )

    partials = pl.pallas_call(
        kernel,
        out_shape=jax.ShapeDtypeStruct((num_cores, acc_rows, LANES), jnp.float32),
        grid_spec=pltpu.PrefetchScalarGridSpec(
            num_scalar_prefetch=0,
            grid=(num_cores, tiles_per_core),
            in_specs=[
                pl.BlockSpec((block_rows, LANES), in_map),
                pl.BlockSpec((block_rows, LANES), in_map),
            ],
            # Lane-dense per-core partial-sum block; it doubles as the in-VMEM
            # accumulator (same block index for every j), so there is no
            # scratch and no in-kernel cross-lane reduce.
            out_specs=pl.BlockSpec((1, acc_rows, LANES), lambda c, j: (c, 0, 0)),
        ),
        compiler_params=pltpu.CompilerParams(
            dimension_semantics=("parallel", "arbitrary"),
            vmem_limit_bytes=VMEM_LIMIT_BYTES,
        ),
    )(pred2d, target2d)

    return jnp.sum(partials) / jnp.float32(n)


if __name__ == "__main__":
    key = jax.random.PRNGKey(0)
    k_pred, k_target, k_pred2, k_target2 = jax.random.split(key, 4)

    # Small NCHW-shaped inputs, consistent with typical dense prediction losses.
    pred = jax.random.normal(k_pred, (2, 4, 16, 16), dtype=jnp.float32)
    target = jax.random.normal(k_target, (2, 4, 16, 16), dtype=jnp.float32)

    loss = weighted_mse_loss(pred, target, pos_weight=4, neg_weight=1)
    loss = jax.block_until_ready(loss)

    w_ref = jnp.where(target > 0, 4.0, 1.0)
    ref = jnp.mean((pred - target) ** 2 * w_ref)
    assert jnp.allclose(loss, ref, rtol=1e-5, atol=1e-5), (loss, ref)

    # Also exercise the non-lane-aligned / ragged-tile (masked boundary) path.
    pred2 = jax.random.normal(k_pred2, (3, 5, 7, 11), dtype=jnp.float32)
    target2 = jax.random.normal(k_target2, (3, 5, 7, 11), dtype=jnp.float32)
    loss2 = jax.block_until_ready(weighted_mse_loss(pred2, target2, 4, 1))
    w_ref2 = jnp.where(target2 > 0, 4.0, 1.0)
    ref2 = jnp.mean((pred2 - target2) ** 2 * w_ref2)
    assert jnp.allclose(loss2, ref2, rtol=1e-5, atol=1e-5), (loss2, ref2)

    print("KERNEL_OK")
</pallas_src>

<mosaic_0001>
module attributes {stable_mosaic.version = 11 : i64} {
  func.func @_wmse_kernel(%arg0: i32, %arg1: i32, %arg2: memref<16x128xf32, #tpu.memory_space<vmem>>, %arg3: memref<16x128xf32, #tpu.memory_space<vmem>>, %arg4: memref<1x8x128xf32, #tpu.memory_space<vmem>>) attributes {dimension_semantics = [#tpu.dimension_semantics<parallel>, #tpu.dimension_semantics<arbitrary>], iteration_bounds = array<i64: 1, 1>, scalar_prefetch = 0 : i64, scratch_operands = 0 : i64, tpu.core_type = #tpu.core_type<tc>, window_params = [{transform_indices = @transform_0, window_bounds = array<i64: 16, 128>}, {transform_indices = @transform_1, window_bounds = array<i64: 16, 128>}, {transform_indices = @transform_2, window_bounds = array<i64: 1, 8, 128>}]} {
    %c0_i32 = arith.constant 0 : i32
    %0 = arith.cmpi eq, %arg1, %c0_i32 : i32
    %1 = arith.extui %0 : i1 to i32
    %c0_i32_0 = arith.constant 0 : i32
    %2 = arith.cmpi ne, %1, %c0_i32_0 : i32
    scf.if %2 {
      %cst_13 = arith.constant 0.000000e+00 : f32
      %19 = vector.broadcast %cst_13 : f32 to vector<1x8x128xf32>
      %c0_14 = arith.constant 0 : index
      %c0_15 = arith.constant 0 : index
      %c0_16 = arith.constant 0 : index
      %20 = vector.load %arg4[%c0_14, %c0_15, %c0_16] : memref<1x8x128xf32, #tpu.memory_space<vmem>>, vector<1x8x128xf32>
      tpu.vector_store %arg4[%c0_14, %c0_15, %c0_16], %19 {strides = array<i32>} : memref<1x8x128xf32, #tpu.memory_space<vmem>>, vector<1x8x128xf32>,
    } else {
    }
    %c0 = arith.constant 0 : index
    %c0_1 = arith.constant 0 : index
    %3 = vector.load %arg2[%c0, %c0_1] : memref<16x128xf32, #tpu.memory_space<vmem>>, vector<16x128xf32>
    %c0_2 = arith.constant 0 : index
    %c0_3 = arith.constant 0 : index
    %4 = vector.load %arg3[%c0_2, %c0_3] : memref<16x128xf32, #tpu.memory_space<vmem>>, vector<16x128xf32>
    %5 = arith.subf %3, %4 : vector<16x128xf32>
    %cst = arith.constant 0.000000e+00 : f32
    %6 = vector.broadcast %cst : f32 to vector<16x128xf32>
    %7 = arith.cmpf ogt, %4, %6 : vector<16x128xf32>
    %cst_4 = arith.constant 4.000000e+00 : f32
    %cst_5 = arith.constant 1.000000e+00 : f32
    %8 = vector.broadcast %cst_4 : f32 to vector<16x128xf32>
    %9 = vector.broadcast %cst_5 : f32 to vector<16x128xf32>
    %10 = arith.select %7, %8, %9 : vector<16x128xi1>, vector<16x128xf32>
    %11 = arith.mulf %5, %5 : vector<16x128xf32>
    %12 = arith.mulf %11, %10 : vector<16x128xf32>
    %c0_6 = arith.constant 0 : index
    %c0_7 = arith.constant 0 : index
    %c0_8 = arith.constant 0 : index
    %13 = vector.load %arg4[%c0_6, %c0_7, %c0_8] : memref<1x8x128xf32, #tpu.memory_space<vmem>>, vector<1x8x128xf32>
    %14 = vector.shape_cast %12 : vector<16x128xf32> to vector<2x8x128xf32>
    %cst_9 = arith.constant dense<0.000000e+00> : vector<8x128xf32>
    %15 = vector.multi_reduction <add>, %14, %cst_9 [0] : vector<2x8x128xf32> to vector<8x128xf32>
    %16 = vector.shape_cast %15 : vector<8x128xf32> to vector<1x8x128xf32>
    %17 = arith.addf %13, %16 : vector<1x8x128xf32>
    %c0_10 = arith.constant 0 : index
    %c0_11 = arith.constant 0 : index
    %c0_12 = arith.constant 0 : index
    %18 = vector.load %arg4[%c0_10, %c0_11, %c0_12] : memref<1x8x128xf32, #tpu.memory_space<vmem>>, vector<1x8x128xf32>
    tpu.vector_store %arg4[%c0_10, %c0_11, %c0_12], %17 {strides = array<i32>} : memref<1x8x128xf32, #tpu.memory_space<vmem>>, vector<1x8x128xf32>,
    return
  }
  func.func @transform_0(%arg0: i32, %arg1: i32) -> (i32, i32) {
    %c1_i32 = arith.constant 1 : i32
    %0 = arith.muli %arg0, %c1_i32 : i32
    %1 = arith.addi %0, %arg1 : i32
    %c0_i32 = arith.constant 0 : i32
    %2 = arith.minsi %1, %c0_i32 : i32
    %c0_i32_0 = arith.constant 0 : i32
    %c0_i32_1 = arith.constant 0 : i32
    return %2, %c0_i32_0 : i32, i32
  }
  func.func @transform_1(%arg0: i32, %arg1: i32) -> (i32, i32) {
    %c1_i32 = arith.constant 1 : i32
    %0 = arith.muli %arg0, %c1_i32 : i32
    %1 = arith.addi %0, %arg1 : i32
    %c0_i32 = arith.constant 0 : i32
    %2 = arith.minsi %1, %c0_i32 : i32
    %c0_i32_0 = arith.constant 0 : i32
    %c0_i32_1 = arith.constant 0 : i32
    return %2, %c0_i32_0 : i32, i32
  }
  func.func @transform_2(%arg0: i32, %arg1: i32) -> (i32, i32, i32) {
    %c0_i32 = arith.constant 0 : i32
    %c0_i32_0 = arith.constant 0 : i32
    %c0_i32_1 = arith.constant 0 : i32
    return %arg0, %c0_i32, %c0_i32_0 : i32, i32, i32
  }
}

</mosaic_0001>

<bundles_post_ra>
// kernel: tpu_custom_call.1
= control target key start
LH: loop header
LB: loop body
LE: loop exit
PB: predicated region body
PF: predicated region fallthrough
CT: control target
= control target key end

     0   :  { %7 = vsyncpa [#allocation3], 0  ;;  %s206_s0 = inlined_call_operand.hbm [shape: f32[16,128], index: 0, kind: input, shape index: {}]   ;;  %s207_s1 = inlined_call_operand.hbm [shape: f32[16,128], index: 1, kind: input, shape index: {}]   ;;  %s208_s2 = inlined_call_operand.hbm [shape: f32[1,8,128], index: 2, kind: output, shape index: {}]  }
   0x1   :  { %8 = vsyncpa [#allocation6], 0 }
   0x2   :  { %9 = vsyncpa [#allocation4], 0  ;;  %s176_s9 = smov [#allocation2]  }
   0x3   :  { %s21_s10 = sshll.u32 %s176_s9, 4  ;;  %s22_s10 = int_to_ptr.vmem [resolvable:$true] %s21_s10 }
   0x4   :  { %s118_s11 = scalar_lea.vmem %s22_s10, 256  ;;  %p123_p1 = scmp.lt.s32.totalorder %s22_s10, %s22_s10 }
   0x5   :  { %p119_p0 = scmp.ne.s32.totalorder %s22_s10, %s118_s11  ;;  %p124_p2 = scmp.lt.s32.totalorder %s118_s11, %s118_s11 }
   0x7   :  { %p125_p3 = por %p124_p2, %p123_p1 }
   0x9   :  { %p126_p4 = pnand %p125_p3, %p119_p0 }
   0xb   :  { %129 = shalt.err (!%p126_p4)
}
   0xc   :  { %s177_s12 = smov 128   ;;  %s178_s13 = smov 8  }
   0xd   :  { %27 = dma.hbm_to_vmem [thread:$0]  %s206_s0, 256, %s22_s10, [#allocation3], %s177_s12, %s177_s12, %s178_s13  }
   0xe   :  { %s179_s16 = smov [#allocation5]  }
   0xf   :  { %s39_s17 = sshll.u32 %s179_s16, 4  ;;  %s40_s17 = int_to_ptr.vmem [resolvable:$true] %s39_s17 }
  0x10   :  { %s138_s18 = scalar_lea.vmem %s40_s17, 256  ;;  %p143_p6 = scmp.lt.s32.totalorder %s40_s17, %s40_s17 }
  0x11   :  { %p139_p5 = scmp.ne.s32.totalorder %s40_s17, %s138_s18  ;;  %p144_p7 = scmp.lt.s32.totalorder %s138_s18, %s138_s18 }
  0x13   :  { %p145_p8 = por %p144_p7, %p143_p6 }
  0x15   :  { %p146_p9 = pnand %p145_p8, %p139_p5 }
  0x17   :  { %149 = shalt.err (!%p146_p9)
}
  0x18   :  { %45 = dma.hbm_to_vmem [thread:$0]  %s207_s1, 256, %s40_s17, [#allocation6], %s177_s12, %s177_s12, %s178_s13  }
  0x19   :  { %170 = dma.done.wait [#allocation3], 256  }
  0x1a   :  { %171 = vsyncadd [#allocation3], 4294967040 }
  0x1b   :  { %172 = dma.done.wait [#allocation6], 256  }
  0x1c   :  { %173 = vsyncadd [#allocation6], 4294967040  ;;  %v65_v0 = vld [vmem:[#allocation2] sm:$0xff]  ;;  %v66_v1 = vld [vmem:[#allocation2 + $0x8] sm:$0xff]  ;;  %v180_v6 = vmov 1.0   ;;  %s181_s0 = smov [#allocation7]  }
  0x1d   :  { %v67_v2 = vld [vmem:[#allocation5] sm:$0xff]  ;;  %v68_v3 = vld [vmem:[#allocation5 + $0x8] sm:$0xff]  ;;  %s89_s1 = sshll.u32 %s181_s0, 4  ;;  %s90_s1 = int_to_ptr.vmem [resolvable:$true] %s89_s1 }
  0x1e   :  { %v69_v4 = vsub.f32 %v65_v0, %v67_v2  ;;  %vm71_vm0 = vcmp.gt.f32.partialorder %v67_v2, 0.0  ;;  %v70_v5 = vsub.f32 %v66_v1, %v68_v3  ;;  %vm72_vm1 = vcmp.gt.f32.partialorder %v68_v3, 0.0  ;;  %s150_s21 = scalar_lea.vmem %s90_s1, 128  ;;  %p155_p11 = scmp.lt.s32.totalorder %s90_s1, %s90_s1 }
  0x1f   :  { %v73_v7 = vsel %vm71_vm0, 4.0, %v180_v6  ;;  %v74_v8 = vsel %vm72_vm1, 4.0, %v180_v6  ;;  %p151_p10 = scmp.ne.s32.totalorder %s90_s1, %s150_s21  ;;  %p156_p12 = scmp.lt.s32.totalorder %s150_s21, %s150_s21 }
  0x20   :  { %v75_v9 = vmul.f32 %v69_v4, %v69_v4  ;;  %v76_v10 = vmul.f32 %v70_v5, %v70_v5 }
  0x21   :  { %p157_p13 = por %p156_p12, %p155_p11 }
  0x22   :  { %v77_v11 = vmul.f32 %v75_v9, %v73_v7  ;;  %v78_v12 = vmul.f32 %v76_v10, %v74_v8 }
  0x23   :  { %p158_p0 = pnand %p157_p13, %p151_p10 }
  0x24   :  { %v80_v13 = vadd.f32 %v78_v12, %v77_v11 }
  0x26   :  { %82 = vst [vmem:[#allocation7] sm:$0xff] %v80_v13 }
  0x27   :  { %161 = shalt.err (!%p158_p0)
}
  0x28   :  { %92 = dma.vmem_to_hbm [thread:$0]  %s90_s1, 128, %s208_s2, [#allocation4]  }
  0x29   :  { %174 = dma.done.wait [#allocation4], 128  }
  0x2a   :  { %175 = vsyncadd [#allocation4], 4294967168 }
  0x2b   :  { %96 = vsyncpa [#allocation3], 1 }
  0x2c   :  { %97 = vsyncpa [#allocation6], 1 }
  0x2d   :  { %98 = vsyncpa [#allocation4], 1 }

</bundles_post_ra>
